<compile_context>
chip_gen: v5e
topology: v5e:2x2
jax: 0.10.0
libtpu: 0.0.40
codegen_flags: <defaults>
</compile_context>

<pallas_src>
import jax
import jax.numpy as jnp
from jax.experimental import pallas as pl
from jax.experimental.pallas import tpu as pltpu


def _round_up(x, m):
    return ((x + m - 1) // m) * m


def _cdiv(a, b):
    return (a + b - 1) // b


# VMEM budgets (bytes) for tile-size selection. Chosen so the double-buffered
# working set stays under every generation's scoped-VMEM default (16 MiB v5e,
# 32 MiB v6e/v7x) and far under v7x's 64 MiB/TC physical VMEM.
_X_TILE_BUDGET = 4 * 1024 * 1024      # per x input buffer
_W_RESIDENT_MAX = 6 * 1024 * 1024     # max weight kept fully VMEM-resident


def _pick_tm(M, row_bytes, sublane, tm_cap):
    """M tile: multiple of `sublane`, within the VMEM budget, and (when possible)
    yielding >= 2 M blocks so both v7x TensorCores get work."""
    if M <= sublane:
        return M                                          # single full-dim block
    tm_budget = max(sublane,
                    (_X_TILE_BUDGET // max(row_bytes, 1)) // sublane * sublane)
    cap = max(sublane, min(tm_budget, tm_cap))
    n_m = max(_cdiv(M, cap), 2)                           # >= 2 blocks (megacore)
    return _round_up(_cdiv(M, n_m), sublane)


def _resident_kernel(x_ref, wt_ref, o_ref):
    """Weight-resident path: one MXU pass over the full K per (tm, N_pad) tile.

    x_ref:  (tm, K)       activation strip
    wt_ref: (K, N_pad)    whole transposed weight (DMA'd once; constant index_map)
    o_ref:  (tm, N_pad)   output tile (single lane-dense store)
    """
    o_ref[...] = jax.lax.dot_general(
        x_ref[...], wt_ref[...],
        dimension_numbers=(((1,), (0,)), ((), ())),
        preferred_element_type=jnp.float32,
    ).astype(o_ref.dtype)


def _make_tiled_kernel(K, tk, ragged_k):
    """General 3-D tiled path with f32 VMEM accumulator."""

    def kernel(x_ref, wt_ref, o_ref, acc_ref):
        # NOTE: this init/accumulate/finalize pattern requires K to be the
        # innermost grid axis and marked "arbitrary" (the accumulator is carried
        # across it). Do not reorder the grid or mark the K axis "parallel".
        k = pl.program_id(2)

        @pl.when(k == 0)
        def _():
            acc_ref[...] = jnp.zeros_like(acc_ref)

        x = x_ref[...]
        if ragged_k:
            # Last K tile extends past the (unpadded) activation: zero the
            # out-of-range columns in-kernel instead of materializing a padded
            # copy of x in HBM. (The weight side is zero-padded on host, so the
            # product in the padded region is exactly 0.)
            col = jax.lax.broadcasted_iota(jnp.int32, x.shape, 1)
            x = jnp.where(col < (K - k * tk), x, jnp.zeros_like(x))

        # Canonical (tm, tk) x (tk, tn) MXU matmul (weight already transposed).
        acc_ref[...] += jax.lax.dot_general(
            x, wt_ref[...],
            dimension_numbers=(((1,), (0,)), ((), ())),
            preferred_element_type=jnp.float32,
        )

        @pl.when(k == pl.num_programs(2) - 1)
        def _():
            o_ref[...] = acc_ref[...].astype(o_ref.dtype)

    return kernel


def key_forward(x, weight, *, compute_dtype=None, weight_resident=None,
                tm_max=512, tn_max=256, tk_max=1024):
    """Pallas equivalent of `Key.forward`: x @ W^T (no bias).

    Args:
      x:      (batch, seq, dim_input)
      weight: (dim_attn, dim_input)  -- native nn.Linear.weight layout
      compute_dtype: optional MXU input dtype (jnp.bfloat16 recommended on
        v6e/v7x; accumulation is always f32). Default None keeps exact f32
        parity with the PyTorch module.
      weight_resident: None = auto (keep weight VMEM-resident when it fits),
        True/False to force a path.
    Returns:
      (batch, seq, dim_attn) in x.dtype
    """
    batch, seq, dim_input = x.shape
    dim_attn, dim_input_w = weight.shape
    assert dim_input_w == dim_input, "weight/input dim mismatch"

    out_dtype = x.dtype
    M, K, N = batch * seq, dim_input, dim_attn

    x2d = x.reshape(M, K)
    w = weight
    if compute_dtype is not None and x2d.dtype != compute_dtype:
        x2d = x2d.astype(compute_dtype)  # TODO(synk): fuse this cast into the producer upstream
    if compute_dtype is not None and w.dtype != compute_dtype:
        w = w.astype(compute_dtype)

    in_b = jnp.dtype(x2d.dtype).itemsize
    out_b = jnp.dtype(out_dtype).itemsize
    sublane = max(8, 32 // in_b)          # 8 f32, 16 bf16, 32 int8/fp8

    if weight_resident is None:
        weight_resident = (
            K * _round_up(N, 128) * in_b <= _W_RESIDENT_MAX
            and K * in_b * sublane <= _X_TILE_BUDGET
        )

    if weight_resident:
        # ---- Weight-resident path: grid over M only, full-K contraction. ----
        N_pad = _round_up(N, 128)                 # lane-dense output stores
        wt = w.T                                  # (K, N): canonical MXU layout
        if N_pad != N:
            wt = jnp.pad(wt, ((0, 0), (0, N_pad - N)))   # tiny, constant-foldable
        tm = _pick_tm(M, K * in_b, sublane, tm_max)
        grid_m = _cdiv(M, tm)

        est_vmem = 2 * (tm * K * in_b + K * N_pad * in_b + tm * N_pad * out_b)
        cost = pl.CostEstimate(
            flops=2 * M * N * K, transcendentals=0,
            bytes_accessed=M * K * in_b + K * N_pad * in_b + M * N_pad * out_b)

        out2d = pl.pallas_call(
            _resident_kernel,
            out_shape=jax.ShapeDtypeStruct((M, N_pad), out_dtype),
            grid_spec=pltpu.PrefetchScalarGridSpec(
                num_scalar_prefetch=0,
                grid=(grid_m,),
                in_specs=[
                    pl.BlockSpec((tm, K), lambda i: (i, 0)),      # x strip (never padded)
                    pl.BlockSpec((K, N_pad), lambda i: (0, 0)),   # resident weight, fetched once
                ],
                out_specs=pl.BlockSpec((tm, N_pad), lambda i: (i, 0)),
            ),
            compiler_params=pltpu.CompilerParams(
                dimension_semantics=("parallel",),
                vmem_limit_bytes=min(64 << 20, max(32 << 20, est_vmem + (4 << 20))),
            ),
            cost_estimate=cost,
        )(x2d, wt)
        return out2d[:, :N].reshape(batch, seq, N)

    # ---- General tiled path: 3-D (M, N, K) grid, f32 VMEM accumulator. ----
    n_k = _cdiv(K, tk_max)
    tk = _round_up(_cdiv(K, n_k), 128)
    if tk >= K:
        tk = K                                    # single full-dim K block
    grid_k = _cdiv(K, tk)
    ragged_k = (K % tk) != 0

    n_n = _cdiv(N, tn_max)
    tn = _round_up(_cdiv(N, n_n), 128)            # lane-dense output stores
    grid_n = _cdiv(N, tn)
    N_pad = grid_n * tn
    K_pad = grid_k * tk

    wt = w.T                                      # (K, N): canonical MXU layout
    if (K_pad, N_pad) != (K, N):
        wt = jnp.pad(wt, ((0, K_pad - K), (0, N_pad - N)))   # zeros: exact

    tm = _pick_tm(M, tk * in_b, sublane, tm_max)
    grid_m = _cdiv(M, tm)

    est_vmem = (2 * (tm * tk * in_b + tk * tn * in_b + tm * tn * out_b)
                + tm * tn * 4)
    cost = pl.CostEstimate(
        flops=2 * M * N * K, transcendentals=0,
        bytes_accessed=(M * K * in_b + grid_m * K_pad * N_pad * in_b
                        + M * N_pad * out_b))

    kernel = _make_tiled_kernel(K, tk, ragged_k)
    out2d = pl.pallas_call(
        kernel,
        out_shape=jax.ShapeDtypeStruct((M, N_pad), out_dtype),
        grid_spec=pltpu.PrefetchScalarGridSpec(
            num_scalar_prefetch=0,
            grid=(grid_m, grid_n, grid_k),        # K innermost: carries accumulator
            in_specs=[
                pl.BlockSpec((tm, tk), lambda i, j, k: (i, k)),   # x tile (never padded)
                pl.BlockSpec((tk, tn), lambda i, j, k: (k, j)),   # W^T tile, canonical layout
            ],
            out_specs=pl.BlockSpec((tm, tn), lambda i, j, k: (i, j)),
            scratch_shapes=[pltpu.VMEM((tm, tn), jnp.float32)],
        ),
        compiler_params=pltpu.CompilerParams(
            dimension_semantics=("parallel", "parallel", "arbitrary"),
            vmem_limit_bytes=min(64 << 20, max(32 << 20, est_vmem + (4 << 20))),
        ),
        cost_estimate=cost,
    )(x2d, wt)
    return out2d[:, :N].reshape(batch, seq, N)


if __name__ == "__main__":
    # Small shapes consistent with the module's forward.
    batch, seq = 2, 8
    dim_input, dim_attn = 32, 16

    key = jax.random.PRNGKey(0)
    kx, kw, kx2, kw2 = jax.random.split(key, 4)

    x = jax.random.normal(kx, (batch, seq, dim_input), dtype=jnp.float32)
    # Deterministic parameter init mimicking nn.Linear default:
    # U(-1/sqrt(dim_input), 1/sqrt(dim_input)).
    bound = 1.0 / (dim_input ** 0.5)
    weight = jax.random.uniform(
        kw, (dim_attn, dim_input), dtype=jnp.float32, minval=-bound, maxval=bound)

    out = jax.block_until_ready(key_forward(x, weight))
    ref = jnp.einsum("bsd,ad->bsa", x, weight)
    assert out.shape == (batch, seq, dim_attn)
    assert jnp.allclose(out, ref, atol=1e-5, rtol=1e-5)

    # Also exercise the general tiled path (multi-step K with in-kernel ragged-K
    # masking) at small shapes, checked against the same reference math.
    dim_input2, dim_attn2 = 200, 48
    x2 = jax.random.normal(kx2, (batch, seq, dim_input2), dtype=jnp.float32)
    bound2 = 1.0 / (dim_input2 ** 0.5)
    weight2 = jax.random.uniform(
        kw2, (dim_attn2, dim_input2), dtype=jnp.float32, minval=-bound2, maxval=bound2)
    out2 = jax.block_until_ready(
        key_forward(x2, weight2, weight_resident=False, tk_max=128, tn_max=128))
    ref2 = jnp.einsum("bsd,ad->bsa", x2, weight2)
    assert out2.shape == (batch, seq, dim_attn2)
    assert jnp.allclose(out2, ref2, atol=1e-4, rtol=1e-4)

    print("KERNEL_OK")
</pallas_src>

<mosaic_0001>
module attributes {stable_mosaic.version = 11 : i64} {
  func.func @_resident_kernel(%arg0: i32, %arg1: memref<8x32xf32, #tpu.memory_space<vmem>>, %arg2: memref<32x128xf32, #tpu.memory_space<vmem>>, %arg3: memref<8x128xf32, #tpu.memory_space<vmem>>) attributes {dimension_semantics = [#tpu.dimension_semantics<parallel>], iteration_bounds = array<i64: 2>, scalar_prefetch = 0 : i64, scratch_operands = 0 : i64, tpu.core_type = #tpu.core_type<tc>, window_params = [{transform_indices = @transform_0, window_bounds = array<i64: 8, 32>}, {pipeline_mode = #tpu.pipeline_mode<synchronous>, transform_indices = @transform_1, window_bounds = array<i64: 32, 128>}, {transform_indices = @transform_2, window_bounds = array<i64: 8, 128>}]} {
    %c0 = arith.constant 0 : index
    %c0_0 = arith.constant 0 : index
    %0 = vector.load %arg1[%c0, %c0_0] : memref<8x32xf32, #tpu.memory_space<vmem>>, vector<8x32xf32>
    %c0_1 = arith.constant 0 : index
    %c0_2 = arith.constant 0 : index
    %1 = vector.load %arg2[%c0_1, %c0_2] : memref<32x128xf32, #tpu.memory_space<vmem>>, vector<32x128xf32>
    %cst = arith.constant dense<0.000000e+00> : vector<8x128xf32>
    %2 = tpu.matmul %0, %1, %cst {dimension_numbers = #tpu.dot_dimension_numbers<[1], [0], [0], [1], [0, 0, 1, 1], [], []>} : vector<8x32xf32>, vector<32x128xf32>, vector<8x128xf32> -> vector<8x128xf32>
    %c0_3 = arith.constant 0 : index
    %c0_4 = arith.constant 0 : index
    %3 = vector.load %arg3[%c0_3, %c0_4] : memref<8x128xf32, #tpu.memory_space<vmem>>, vector<8x128xf32>
    tpu.vector_store %arg3[%c0_3, %c0_4], %2 {strides = array<i32>} : memref<8x128xf32, #tpu.memory_space<vmem>>, vector<8x128xf32>,
    return
  }
  func.func @transform_0(%arg0: i32) -> (i32, i32) {
    %c0_i32 = arith.constant 0 : i32
    %c0_i32_0 = arith.constant 0 : i32
    return %arg0, %c0_i32 : i32, i32
  }
  func.func @transform_1(%arg0: i32) -> (i32, i32) {
    %c0_i32 = arith.constant 0 : i32
    %c0_i32_0 = arith.constant 0 : i32
    %c0_i32_1 = arith.constant 0 : i32
    return %c0_i32, %c0_i32_0 : i32, i32
  }
  func.func @transform_2(%arg0: i32) -> (i32, i32) {
    %c0_i32 = arith.constant 0 : i32
    %c0_i32_0 = arith.constant 0 : i32
    return %arg0, %c0_i32 : i32, i32
  }
}

</mosaic_0001>

<bundles_post_ra>
// kernel: tpu_custom_call.1
= control target key start
LH: loop header
LB: loop body
LE: loop exit
PB: predicated region body
PF: predicated region fallthrough
CT: control target
= control target key end

     0   :  { %7 = vsyncpa [#allocation3], 0  ;;  %s664_s0 = inlined_call_operand.hbm [shape: f32[16,32], index: 0, kind: input, shape index: {}]   ;;  %s665_s1 = inlined_call_operand.hbm [shape: f32[32,128], index: 1, kind: input, shape index: {}]   ;;  %s666_s2 = inlined_call_operand.hbm [shape: f32[16,128], index: 2, kind: output, shape index: {}]  }
   0x1   :  { %9 = vsyncpa [#allocation3 + $0x1], 0 }
   0x2   :  { %10 = vsyncpa [#allocation6], 0 }
   0x3   :  { %11 = vsyncpa [#allocation4], 0 }
   0x4   :  { %13 = vsyncpa [#allocation4 + $0x1], 0  ;;  %s528_s9 = smov 0   ;;  %s530_s10 = smov 0  }
   0x5   :  { %s532_s11 = smov 0   ;;  %s534_s12 = smov 0  }
   0x6 LB: > { %s108_s15 = sshll.u32 %s665_s1, 4  ;;  %s552_s16 = sadd.s32 4294967295, %s508_s12   ;;  %s508_s12 = sphi %s534_s12, %s676_s12   ;;  %s504_s11 = sphi %s532_s11, %s675_s11   ;;  %s500_s10 = sphi %s530_s10, %s674_s10   ;;  %s496_s9 = sphi %s528_s9, %s673_s9   ;;  %s109_s15 = int_to_ptr.hbm [resolvable:$true] %s108_s15 }
   0x7   : > { %p305_p0 = scmp.ge.s32.totalorder %s508_s12, 1  ;;  %p40_p1 = scmp.eq.s32.totalorder %s552_s16, 0 }
   0x8   : > { %p97_p2 = scmp.lt.s32.totalorder %s508_s12, 3  ;;  %s510_s18 = smov [#allocation5]  }
   0x9   : > { %s110_s19 = sshll.u32 %s510_s18, 4  ;;  %s511_s20 = smov 128   ;;  %s111_s19 = int_to_ptr.vmem [resolvable:$true] %s110_s19 }
   0xa   : > { %p557_p3 = pnand %p305_p0, %p97_p2  ;;  %s512_s21 = smov 8  }
   0xb   : > { %s304_s22 = sadd.s32 4294967294, %s508_s12   ;;  %s568_s23 = sadd.s32 1, %s508_s12  }
   0xc   : > { %p327_p4 = pneg %p557_p3  ;;  %s26_s24 = sadd.s32 1, %s504_s11 }
   0xd   : > { %s23_s25 = ssub.s32 %s508_s12, %s568_s23  ;;  %p33_p7 = scmp.ne.s32.totalorder %s504_s11, %s500_s10 }
   0xe   : > { %p328_p6 = pnand %p327_p4, %p40_p1  ;;  %p24_p8 = scmp.eq.s32.totalorder %s23_s25, 0 }
   0xf   : > { %p34_p9 = scmp.eq.s32.totalorder %s508_s12, 0  ;;  %p39_p10 = scmp.ne.s32.totalorder %s500_s10, %s496_s9 }
  0x10   : > { %330 = dma.hbm_to_vmem [thread:$0]  (!%p328_p6), %s109_s15, 512, %s111_s19, [#allocation6], %s511_s20, %s511_s20, %s512_s21  }
  0x11   : > { %p84_p11 = scmp.eq.s32.totalorder %s552_s16, 1  ;;  %p584_p12 = por %p40_p1, %p39_p10 }
  0x12   : > { %s580_s26 = scalar_select %p24_p8, %s504_s11, %s26_s24  }
  0x13   : > { %p588_p13 = por %p84_p11, %p33_p7  ;;  %p90_p0 = scmp.eq.s32.totalorder %s304_s22, 1 }
  0x14   : > { %p35_p2 = por %p34_p9, %p33_p7  ;;  %s124_s29 = sand.u32 1, %s504_s11  }
  0x15   : > { %p593_p4 = por %p90_p0, %p39_p10  ;;  %p340_p6 = scmp.lt.s32.totalorder %s508_s12, 2 }
  0x16   : > { %s308_s3 = sshll.u32 %s124_s29, 3  ;;  %s309_s4 = sshll.u32 %s508_s12, 3 }
  0x17   : > { %s132_s7 = scalar_lea.hbm %s664_s0, %s309_s4  ;;  %s128_s13 = scalar_lea.vmem [#allocation2], %s308_s3 }
  0x18   : > { %s134_s8 = sshll.u32 %s132_s7, 4  ;;  %s136_s14 = sshll.u32 %s128_s13, 4  ;;  %s135_s8 = int_to_ptr.hbm [resolvable:$true] %s134_s8  ;;  %s137_s14 = int_to_ptr.vmem [resolvable:$true] %s136_s14 }
  0x19   : > { %p602_p8 = pnand %p340_p6, %p35_p2  ;;  %s125_s18 = scalar_lea.sflag [#allocation3], %s124_s29 }
  0x1a   : > { %s408_s19 = sshra.s32 %s135_s8, 4  ;;  %s415_s24 = scalar_lea.hbm %s664_s0, 16  ;;  %s409_s19 = int_to_ptr.hbm [resolvable:$true] %s408_s19 }
  0x1b   : > { %s410_s20 = scalar_lea.hbm %s409_s19, 8  ;;  %p412_p9 = pneg %p602_p8 }
  0x1c   : > { %p411_p7 = scmp.ne.s32.totalorder %s409_s19, %s410_s20  ;;  %p416_p0 = scmp.lt.s32.totalorder %s409_s19, %s664_s0 }
  0x1d   : > { %p417_p2 = scmp.lt.s32.totalorder %s415_s24, %s410_s20 }
  0x1e   : > { %p413_p10 = pnand %p412_p9, %p411_p7 }
  0x1f   : > { %p418_p6 = por %p417_p2, %p416_p0 }
  0x20   : > { %p414_p11 = pneg %p413_p10 }
  0x22   : > { %p419_p5 = pnand %p418_p6, %p414_p11 }
  0x24   : > { %422 = shalt.err (!%p419_p5)
}
  0x25   : > { %334 = dma.hbm_to_vmem [thread:$0]  (!%p602_p8), %s135_s8, 128, %s137_s14, %s125_s18  }
  0x26   : > { %145 = sbr.rel (%p557_p3) target bundleno = 183 (0xb7), region = 28  ;;  %s619_s29 = sand.u32 (!%p557_p3), 1, %s500_s10  }
  0x27   : > { %s311_s4 = sshll.u32 (!%p557_p3), %s619_s29, 3  ;;  %s148_s5 = scalar_lea.sflag (!%p557_p3), [#allocation3], %s619_s29 }
  0x28   : > { %s151_s6 = scalar_lea.vmem (!%p557_p3), [#allocation2], %s311_s4 }
  0x2b   : > { %483 = dma.done.wait (%p584_p12), %s148_s5, 128  }
  0x2c   : > { %485 = vsyncadd (%p584_p12), %s148_s5, 4294967168 }
  0x2d   : > { %487 = dma.done.wait (%p40_p1), [#allocation6], 512  }
  0x2e   : > { %489 = vsyncadd (%p40_p1), [#allocation6], 4294966784  ;;  %v182_v0 = vld [vmem:[#allocation5 + $0x18] sm:$0xff]  ;;  %v181_v1 = vld [vmem:[#allocation5 + $0x10] sm:$0xff]  ;;  %vm183_vm0 = vcmask 261120   ;;  %s316_s17 = sshll.u32 %s552_s16, 3 }
  0x2f   : > { %199 = vmatpush.msra.mxu0 %v182_v0  ;;  %v180_v2 = vld [vmem:[#allocation5 + $0x8] sm:$0xff]  ;;  %v179_v3 = vld [vmem:[#allocation5] sm:$0xff]  ;;  %v178_v4 = vld [vmem:[%s151_s6] sm:$0xff]  ;;  %s219_s8 = scalar_lea.hbm %s666_s2, %s316_s17  ;;  %s177_s13 = scalar_lea.vmem [#allocation7], %s311_s4 }
  0x30   : > { %s221_s14 = sshll.u32 %s177_s13, 4  ;;  %s223_s15 = sshll.u32 %s219_s8, 4  ;;  %s222_s14 = int_to_ptr.vmem [resolvable:$true] %s221_s14  ;;  %s224_s15 = int_to_ptr.hbm [resolvable:$true] %s223_s15 }
  0x31   : > { %200 = vmatpush.msra.mxu0 %v181_v1  ;;  %s209_s18 = scalar_lea.sflag [#allocation4], %s619_s29  ;;  %s452_s19 = sshra.s32 %s224_s15, 4  ;;  %s453_s19 = int_to_ptr.hbm [resolvable:$true] %s452_s19 }
  0x32   : > { %s454_s20 = scalar_lea.hbm %s453_s19, 8  ;;  %s458_s22 = scalar_lea.hbm %s666_s2, 16 }
  0x33   : > { %201 = vmatpush.msra.mxu0 %v180_v2  ;;  %p455_p1 = scmp.ne.s32.totalorder %s453_s19, %s454_s20  ;;  %p459_p12 = scmp.lt.s32.totalorder %s453_s19, %s666_s2 }
  0x34   : > { %p460_p8 = scmp.lt.s32.totalorder %s458_s22, %s454_s20 }
  0x35   : > { %202 = vmatpush.msra.mxu0 %v179_v3  ;;  %p456_p3 = pnand %p455_p1, %p588_p13 }
  0x36   : > { %314 = vmatmul.msk.f32.vlgmr.msra.gmra.mxu0 %vm183_vm0, %v178_v4  ;;  %p461_p7 = por %p460_p8, %p459_p12 }
  0x37   : > { %p457_p5 = pneg %p456_p3 }
  0x39   : > { %p462_p9 = pnand %p461_p7, %p457_p5 }
  0xb3   : > { %v204_v5 = vpop.f32.mrf.mxu0 }
  0xb4   : > { %207 = vst [vmem:[%s177_s13] sm:$0xff] %v204_v5 }
  0xb5   : > { %465 = shalt.err (!%p462_p9)
}
  0xb6   : > { %325 = dma.vmem_to_hbm [thread:$0]  (%p588_p13), %s222_s14, 128, %s224_s15, %s209_s18  }
  0xb7 PF: > { %s235_s3 = sand.u32 1, %s496_s9   ;;  %p672_p10 = scmp.ge.s32.totalorder %s508_s12, 2 }
  0xb8   : > { %s236_s29 = scalar_lea.sflag [#allocation4], %s235_s3 }
  0xb9   : > { %p336_p11 = pnand %p672_p10, %p593_p4 }
  0xbb   : > { %p337_p0 = pneg %p336_p11 }
  0xbd   : > { %491 = dma.done.wait (%p337_p0), %s236_s29, 128  }
  0xbe   : > { %493 = vsyncadd (%p337_p0), %s236_s29, 4294967168  ;;  %p16_p2 = scmp.ge.s32.totalorder %s568_s23, 4   ;;  %s673_s9 = smov %s500_s10 }
  0xbf   : > { %s674_s10 = smov %s504_s11  ;;  %s675_s11 = smov %s580_s26 }
  0xc0   : > { %s676_s12 = smov %s568_s23  ;;  %18 = sbr.rel (!%p16_p2) target bundleno = 6 (0x6), region = 77 }
  0xc5   :  { %242 = vsyncpa [#allocation3], 1 }
  0xc6   :  { %244 = vsyncpa [#allocation3 + $0x1], 1 }
  0xc7   :  { %245 = vsyncpa [#allocation6], 1 }
  0xc8   :  { %246 = vsyncpa [#allocation4], 1 }
  0xc9   :  { %248 = vsyncpa [#allocation4 + $0x1], 1 }

</bundles_post_ra>
